<compile_context>
chip_gen: v7x
topology: tpu7x:2x2x1
jax: 0.10.0
libtpu: 0.0.40
codegen_flags: <defaults>
</compile_context>

<pallas_src>
from heapq import heapify, heappop

import numpy as np
import jax
import jax.numpy as jnp
from jax.experimental import pallas as pl
from jax.experimental.pallas import tpu as pltpu


def _round_up(x, m):
    return ((x + m - 1) // m) * m


# ----------------------------- tile selection ---------------------------------

def _pick_tiles(c_rows, E, T, *, budget_bytes=28 * 1024 * 1024,
                tk_cap=2048, tn_cap=2048):
    """Choose lane-aligned (tk, tn) tiles for the rebuild matmul.

    Sized against v7x's 64 MiB VMEM (32 MiB default scoped): double-buffered
    bf16 fe/groups input blocks plus the resident f32 output/accumulator block
    must stay under `budget_bytes`.  Prefers a single T tile (tn == padded T)
    so fe is DMAed only once per mesh, shrinking tk first, then tn.
    """
    Ep0 = _round_up(E, 128)
    Tp0 = _round_up(T, 128)

    def vmem_bytes(tk, tn):
        fe_blk = c_rows * tk * 2        # bf16, double-buffered
        g_blk = tk * tn * 2             # bf16, double-buffered
        out_blk = c_rows * tn * 4       # f32, k-resident accumulator
        return 2 * (fe_blk + g_blk) + 2 * out_blk

    tk = min(Ep0, tk_cap)
    tn = min(Tp0, tn_cap)
    while vmem_bytes(tk, tn) > budget_bytes and tk > 128:
        tk = max(128, (tk // 2) // 128 * 128)
    while vmem_bytes(tk, tn) > budget_bytes and tn > 128:
        tn = max(128, (tn // 2) // 128 * 128)
    return tk, tn


# ----------------------------- Pallas kernel 1 ---------------------------------

def _prep_kernel(fe_ref, sq_ref, febf_ref):
    # fe block: (1, C, te) native dtype; sq block: (1, 1, te) f32;
    # febf block: (1, C+1, te) bf16 (last row = ones, for MXU occurrence count).
    C = fe_ref.shape[1]
    x = fe_ref[0]                                   # (C, te) native dtype
    xf = x.astype(jnp.float32)
    sq_ref[0] = jnp.sum(xf * xf, axis=0, keepdims=True)
    febf_ref[0, 0:C, :] = x.astype(jnp.bfloat16)
    febf_ref[0, C:C + 1, :] = jnp.ones((1, x.shape[1]), jnp.bfloat16)


def mesh_pool_prepare(fe, tk, *, slab_budget_bytes=24 * 1024 * 1024):
    """Kernel 1: squared magnitudes + fused bf16 downcast with appended ones row.

    Returns (sqmag (B, E) float32, fe1 (B, C+1, Ep) bfloat16) with Ep a
    multiple of tk (so kernel 2 can reuse fe1 without re-padding).
    """
    B, C, E = fe.shape
    Ep = _round_up(E, tk)
    if Ep != E:
        fe = jnp.pad(fe, ((0, 0), (0, 0), (0, Ep - E)))

    # Whole-edge slab per grid step whenever it fits: the kernel is pure
    # HBM-read bound, so large blocks keep grid-step overhead negligible.
    per_col = 2 * (C * fe.dtype.itemsize + 4 + (C + 1) * 2)   # dbl-buffered io
    te = Ep if Ep * per_col <= slab_budget_bytes else tk

    sq, fe1 = pl.pallas_call(
        _prep_kernel,
        out_shape=(jax.ShapeDtypeStruct((B, 1, Ep), jnp.float32),
                   jax.ShapeDtypeStruct((B, C + 1, Ep), jnp.bfloat16)),
        grid=(B, Ep // te),
        in_specs=[pl.BlockSpec((1, C, te), lambda b, e: (b, 0, e))],
        out_specs=[pl.BlockSpec((1, 1, te), lambda b, e: (b, 0, e)),
                   pl.BlockSpec((1, C + 1, te), lambda b, e: (b, 0, e))],
        compiler_params=pltpu.CompilerParams(
            dimension_semantics=("parallel", "parallel"),
            vmem_limit_bytes=32 * 1024 * 1024),
    )(fe)
    return sq[:, 0, :E], fe1


# ----------------------------- Pallas kernel 2 ---------------------------------

def _rebuild_kernel(fe_ref, g_ref, out_ref):
    # fe block: (1, C+1, tk) bf16 (last row = ones); groups block: (1, tk, tn)
    # bf16; out block: (1, C+1, tn) f32.  The out block's index map is
    # k-invariant, so it stays VMEM-resident across the E reduction and is the
    # accumulator itself (no scratch).  Occurrences fall out of the MXU as the
    # last accumulator row.
    k = pl.program_id(2)

    @pl.when(k == 0)
    def _init():
        out_ref[...] = jnp.zeros_like(out_ref)

    out_ref[0] += jnp.dot(fe_ref[0], g_ref[0],
                          preferred_element_type=jnp.float32)

    @pl.when(k == pl.num_programs(2) - 1)
    def _finalize():
        acc = out_ref[0]                       # (C+1, tn)
        occ = acc[-1:, :]                      # ones-row dot -> group sizes
        # occ==0 -> padded / empty target columns; emit 0 (matches torch pad).
        safe = jnp.where(occ == 0.0, 1.0, occ)
        out_ref[0] = acc / safe                # exact divide, once per tile


def rebuild_features(fe1, groups, *, out_channels, out_target, tk, tn):
    """fe1: (B, C+1, Ep) bf16 (ones row appended), groups: (B, Ep, Tp) bf16 0/1
    -> (B, out_channels, out_target) f32 group-averaged features."""
    B, C1, Ep = fe1.shape
    _, Ep_g, Tp = groups.shape
    assert Ep == Ep_g and Ep % tk == 0 and Tp % tn == 0
    n_t, n_k = Tp // tn, Ep // tk

    cost = pl.CostEstimate(
        flops=2 * B * C1 * Ep * Tp,
        transcendentals=0,
        bytes_accessed=B * (C1 * Ep * 2 * n_t + Ep * Tp * 2 + C1 * Tp * 4),
    )

    out = pl.pallas_call(
        _rebuild_kernel,
        out_shape=jax.ShapeDtypeStruct((B, C1, Tp), jnp.float32),
        grid=(B, n_t, n_k),
        in_specs=[
            pl.BlockSpec((1, C1, tk), lambda b, j, k: (b, 0, k)),
            pl.BlockSpec((1, tk, tn), lambda b, j, k: (b, k, j)),
        ],
        out_specs=pl.BlockSpec((1, C1, tn), lambda b, j, k: (b, 0, j)),
        compiler_params=pltpu.CompilerParams(
            dimension_semantics=("parallel", "parallel", "arbitrary"),
            vmem_limit_bytes=40 * 1024 * 1024),
        cost_estimate=cost,
    )(fe1, groups)
    return out[:, :out_channels, :out_target]


# --------------------------- Host-side mesh logic -----------------------------

class MeshUnion:
    """NumPy port of MeshCNN's MeshUnion group bookkeeping (host side)."""

    def __init__(self, n):
        self.groups = np.eye(n, dtype=np.float32)

    def union(self, source, target):
        self.groups[target, :] += self.groups[source, :]

    def remove_group(self, index):
        return

    def prepared_groups(self, mask):
        # (E, n_kept) clamped 0/1 group matrix, as in prepare_groups()
        return np.clip(self.groups[mask, :], 0.0, 1.0).T


class SimpleMesh:
    """Minimal stand-in for the Mesh object: only edges_count is needed here."""

    def __init__(self, edges_count):
        self.edges_count = edges_count

    def clean(self, mask, edge_groups):
        return


class MeshPool:
    """JAX/Pallas re-implementation of the MeshPool forward pass."""

    def __init__(self, target):
        self.__out_target = target

    def __call__(self, fe, meshes):
        return self.forward(fe, meshes)

    def forward(self, fe, meshes):
        B, C, E = fe.shape
        target = self.__out_target

        tk, tn = _pick_tiles(C + 1, E, target)

        # --- Pallas kernel 1: squared magnitudes + fused bf16 fe (+ ones row) -
        sqmag_dev, fe1 = mesh_pool_prepare(fe, tk)        # (B,E) f32, (B,C+1,Ep) bf16
        Ep = fe1.shape[-1]
        Tp = _round_up(target, tn)
        sqmag = np.asarray(jax.device_get(sqmag_dev))     # host heap keys

        # Groups built on the host already padded to (B, Ep, Tp) and in bf16:
        # no device-side pad/astype and a 2x narrower host->device transfer.
        groups_all = np.zeros((B, Ep, Tp), dtype=jnp.bfloat16)
        for mesh_index in range(B):
            mesh = meshes[mesh_index]
            ec = mesh.edges_count

            # __build_queue: heap of [squared_magnitude, edge_id]
            heap = [[float(sqmag[mesh_index, e]), float(e)] for e in range(ec)]
            heapify(heap)

            mask = np.ones(ec, dtype=bool)
            edge_groups = MeshUnion(ec)

            while mesh.edges_count > target:
                if len(heap) < 1:
                    break
                _, edge_id = heappop(heap)
                edge_id = int(edge_id)
                if mask[edge_id]:
                    # simplified __pool_edge: merge this edge into the next
                    # surviving edge (deterministic), drop it from the mask.
                    nbr = (edge_id + 1) % ec
                    while not mask[nbr]:
                        nbr = (nbr + 1) % ec
                    edge_groups.union(edge_id, nbr)
                    mask[edge_id] = False
                    edge_groups.remove_group(edge_id)
                    mesh.edges_count -= 1

            mesh.clean(mask, edge_groups)

            g = edge_groups.prepared_groups(mask)          # (ec, kept)
            kept = g.shape[1]
            if kept > target:
                # Heap emptied before reaching target (torch original grows the
                # target instead); clamp so shapes stay static.
                g = g[:, :target]
                kept = target
            groups_all[mesh_index, :g.shape[0], :kept] = g.astype(groups_all.dtype)

        # --- Pallas kernel 2: grouped-average feature rebuild ------------------
        out = rebuild_features(fe1, jnp.asarray(groups_all),
                               out_channels=C, out_target=target,
                               tk=tk, tn=tn)               # (B, C, T)

        # torch.cat(...).view(len(meshes), -1, target)
        return out.reshape(B, -1, target)


# ------------------------------ Pure-NumPy reference ---------------------------

def _reference(fe, groups):
    fe = np.asarray(fe, dtype=np.float32)
    groups = np.asarray(groups, dtype=np.float32)
    out = np.einsum('bce,bet->bct', fe, groups)
    occ = groups.sum(axis=1, keepdims=True)
    occ = np.where(occ == 0.0, 1.0, occ)
    return out / occ


# ----------------------------------- main -------------------------------------

if __name__ == "__main__":
    B, C, E, TARGET = 2, 4, 16, 8

    key = jax.random.PRNGKey(0)
    fe = jax.random.normal(key, (B, C, E), dtype=jnp.float32)
    meshes = [SimpleMesh(E) for _ in range(B)]

    pool = MeshPool(TARGET)
    out = pool(fe, meshes)
    out = jax.block_until_ready(out)

    assert out.shape == (B, C, TARGET), out.shape
    assert out.dtype == jnp.float32
    assert bool(jnp.isfinite(out).all()), "non-finite values in pooled features"

    # --- standalone kernel checks -------------------------------------------
    tk, tn = _pick_tiles(C + 1, E, TARGET)
    sq, fe1 = mesh_pool_prepare(fe, tk)
    sq = jax.block_until_ready(sq)
    np.testing.assert_allclose(np.asarray(sq),
                               np.sum(np.asarray(fe) ** 2, axis=1),
                               rtol=1e-5, atol=1e-5)

    # fused bf16 cast + ones row (bf16 rounding ~2^-8 relative)
    fe1_np = np.asarray(jax.device_get(fe1)).astype(np.float32)
    np.testing.assert_allclose(fe1_np[:, :C, :E], np.asarray(fe),
                               rtol=1e-2, atol=1e-2)
    np.testing.assert_allclose(fe1_np[:, C, :], 1.0)

    # rebuild kernel vs numpy reference (one-hot groups: each output column
    # copies one fe column; bf16 operands -> 1e-2 tolerance)
    Ep = fe1.shape[-1]
    Tp = _round_up(TARGET, tn)
    g_np = np.zeros((B, E, TARGET), dtype=np.float32)
    g_np[:, :TARGET, :] = np.eye(TARGET, dtype=np.float32)[None]
    g_pad = np.zeros((B, Ep, Tp), dtype=jnp.bfloat16)
    g_pad[:, :E, :TARGET] = g_np.astype(jnp.bfloat16)
    chk = jax.block_until_ready(
        rebuild_features(fe1, jnp.asarray(g_pad),
                         out_channels=C, out_target=TARGET, tk=tk, tn=tn))
    np.testing.assert_allclose(np.asarray(chk), _reference(fe, g_np),
                               rtol=1e-2, atol=1e-2)

    print("KERNEL_OK")
</pallas_src>

<mosaic_0001>
module attributes {stable_mosaic.version = 11 : i64} {
  func.func @_prep_kernel(%arg0: i32, %arg1: i32, %arg2: memref<1x4x128xf32, #tpu.memory_space<vmem>>, %arg3: memref<1x1x128xf32, #tpu.memory_space<vmem>>, %arg4: memref<1x5x128xbf16, #tpu.memory_space<vmem>>) attributes {dimension_semantics = [#tpu.dimension_semantics<parallel>, #tpu.dimension_semantics<parallel>], iteration_bounds = array<i64: 2, 1>, scalar_prefetch = 0 : i64, scratch_operands = 0 : i64, tpu.core_type = #tpu.core_type<tc>, window_params = [{transform_indices = @transform_0, window_bounds = array<i64: 1, 4, 128>}, {transform_indices = @transform_1, window_bounds = array<i64: 1, 1, 128>}, {transform_indices = @transform_2, window_bounds = array<i64: 1, 5, 128>}]} {
    %c0 = arith.constant 0 : index
    %c0_0 = arith.constant 0 : index
    %c0_1 = arith.constant 0 : index
    %0 = vector.load %arg2[%c0, %c0_0, %c0_1] : memref<1x4x128xf32, #tpu.memory_space<vmem>>, vector<1x4x128xf32>
    %1 = vector.shape_cast %0 : vector<1x4x128xf32> to vector<4x128xf32>
    %2 = arith.mulf %1, %1 : vector<4x128xf32>
    %cst = arith.constant dense<0.000000e+00> : vector<128xf32>
    %3 = vector.multi_reduction <add>, %2, %cst [0] : vector<4x128xf32> to vector<128xf32>
    %4 = vector.shape_cast %3 : vector<128xf32> to vector<1x128xf32>
    %c0_2 = arith.constant 0 : index
    %c0_3 = arith.constant 0 : index
    %c0_4 = arith.constant 0 : index
    %5 = vector.load %arg3[%c0_2, %c0_3, %c0_4] : memref<1x1x128xf32, #tpu.memory_space<vmem>>, vector<1x1x128xf32>
    %6 = vector.shape_cast %5 : vector<1x1x128xf32> to vector<1x128xf32>
    %7 = vector.shape_cast %4 : vector<1x128xf32> to vector<1x1x128xf32>
    tpu.vector_store %arg3[%c0_2, %c0_3, %c0_4], %7 {strides = array<i32>} : memref<1x1x128xf32, #tpu.memory_space<vmem>>, vector<1x1x128xf32>,
    %8 = arith.truncf %1 : vector<4x128xf32> to vector<4x128xbf16>
    %c0_5 = arith.constant 0 : index
    %c0_6 = arith.constant 0 : index
    %c0_7 = arith.constant 0 : index
    %9 = vector.load %arg4[%c0_5, %c0_6, %c0_7] : memref<1x5x128xbf16, #tpu.memory_space<vmem>>, vector<1x4x128xbf16>
    %10 = vector.shape_cast %9 : vector<1x4x128xbf16> to vector<4x128xbf16>
    %11 = vector.shape_cast %8 : vector<4x128xbf16> to vector<1x4x128xbf16>
    tpu.vector_store %arg4[%c0_5, %c0_6, %c0_7], %11 {strides = array<i32>} : memref<1x5x128xbf16, #tpu.memory_space<vmem>>, vector<1x4x128xbf16>,
    %cst_8 = arith.constant 1.000000e+00 : bf16
    %12 = vector.broadcast %cst_8 : bf16 to vector<1x128xbf16>
    %c0_9 = arith.constant 0 : index
    %c4 = arith.constant 4 : index
    %c0_10 = arith.constant 0 : index
    %13 = vector.load %arg4[%c0_9, %c4, %c0_10] : memref<1x5x128xbf16, #tpu.memory_space<vmem>>, vector<1x1x128xbf16>
    %14 = vector.shape_cast %13 : vector<1x1x128xbf16> to vector<1x128xbf16>
    %15 = vector.shape_cast %12 : vector<1x128xbf16> to vector<1x1x128xbf16>
    tpu.vector_store %arg4[%c0_9, %c4, %c0_10], %15 {strides = array<i32>} : memref<1x5x128xbf16, #tpu.memory_space<vmem>>, vector<1x1x128xbf16>,
    return
  }
  func.func @transform_0(%arg0: i32, %arg1: i32) -> (i32, i32, i32) {
    %c0_i32 = arith.constant 0 : i32
    %c0_i32_0 = arith.constant 0 : i32
    return %arg0, %c0_i32, %arg1 : i32, i32, i32
  }
  func.func @transform_1(%arg0: i32, %arg1: i32) -> (i32, i32, i32) {
    %c0_i32 = arith.constant 0 : i32
    %c0_i32_0 = arith.constant 0 : i32
    return %arg0, %c0_i32, %arg1 : i32, i32, i32
  }
  func.func @transform_2(%arg0: i32, %arg1: i32) -> (i32, i32, i32) {
    %c0_i32 = arith.constant 0 : i32
    %c0_i32_0 = arith.constant 0 : i32
    return %arg0, %c0_i32, %arg1 : i32, i32, i32
  }
}

</mosaic_0001>

<bundles_post_ra>
// kernel: tpu_custom_call.1
= control target key start
LH: loop header
LB: loop body
LE: loop exit
PB: predicated region body
PF: predicated region fallthrough
CT: control target
= control target key end

     0   :  { %8 = vsyncpa [#allocation3], 0  ;;  %s728_s0 = inlined_call_operand.hbm [shape: f32[2,4,128], index: 0, kind: input, shape index: {}]   ;;  %s729_s1 = inlined_call_operand.hbm [shape: f32[2,1,128], index: 1, kind: output, shape index: {0}]   ;;  %s730_s2 = inlined_call_operand.vmem [shape: bf16[2,5,128], index: 2, kind: output, shape index: {1}]  }
   0x1   :  { %10 = vsyncpa [#allocation3 + $0x1], 0 }
   0x2   :  { %11 = vsyncpa [#allocation4], 0 }
   0x3   :  { %13 = vsyncpa [#allocation4 + $0x1], 0  ;;  %s550_s9 = smov 0   ;;  %s552_s10 = smov 0  }
   0x4   :  { %s554_s11 = smov 0   ;;  %s556_s12 = smov 0  }
   0x5   :  { %s558_s13 = smov 0   ;;  %s560_s14 = smov 0  }
   0x6 LB: > { %s345_s15 = sadd.s32 4294967295, %s531_s14   ;;  %s346_s16 = sadd.s32 4294967294, %s531_s14   ;;  %s531_s14 = sphi %s560_s14, %s19_s14   ;;  %s527_s13 = sphi %s558_s13, %s746_s13   ;;  %s523_s12 = sphi %s556_s12, %s745_s12   ;;  %s519_s11 = sphi %s554_s11, %s744_s11   ;;  %s515_s10 = sphi %s552_s10, %s743_s10   ;;  %s511_s9 = sphi %s550_s9, %s742_s9  }
   0x7   : > { %s31_s17 = sadd.s32 1, %s527_s13  ;;  %s40_s18 = sadd.s32 1, %s519_s11 }
   0x8   : > { %p33_p0 = scmp.ge.s32.totalorder %s31_s17, 2  ;;  %p47_p1 = scmp.ne.s32.totalorder %s519_s11, %s515_s10 }
   0x9   : > { %p48_p2 = scmp.eq.s32.totalorder %s531_s14, 0  ;;  %p53_p3 = scmp.ne.s32.totalorder %s515_s10, %s511_s9 }
   0xa   : > { %s748_s17 = smov (%p33_p0, %s31_s17), 0  ;;  %p54_p5 = scmp.eq.s32.totalorder %s345_s15, 0 }
   0xb   : > { %p591_p4 = por %p48_p2, %p47_p1  ;;  %s35_s20 = ssub.s32 %s527_s13, %s748_s17 }
   0xc   : > { %p79_p6 = scmp.eq.s32.totalorder %s345_s15, 1  ;;  %p38_p7 = scmp.eq.s32.totalorder %s35_s20, 0 }
   0xd   : > { %p597_p8 = por %p54_p5, %p53_p3  ;;  %p85_p10 = scmp.eq.s32.totalorder %s346_s16, 1 }
   0xe   : > { %p601_p9 = por %p79_p6, %p47_p1  ;;  %p369_p13 = scmp.lt.s32.totalorder %s531_s14, 2 }
   0xf   : > { %s606_s23 = scalar_select %p38_p7, %s519_s11, %s40_s18  }
  0x10   : > { %s734_s22 = scalar_select %p601_p9, 1, 0 }
  0x11   : > { %p608_p11 = por %p85_p10, %p53_p3  ;;  %s133_s25 = sand.u32 1, %s519_s11  }
  0x12   : > { %s349_s26 = sshll.u32 %s133_s25, 2  ;;  %s350_s27 = sshll.u32 %s527_s13, 6 }
  0x13   : > { %s735_s24 = scalar_select %p608_p11, 1, 0 }
  0x14   : > { %s619_s30 = scalar_lea.hbm %s728_s0, %s350_s27  ;;  %s137_s3 = scalar_lea.vmem [#allocation2], %s349_s26 }
  0x15   : > { %s145_s4 = sshll.u32 %s137_s3, 4  ;;  %p625_p0 = pnand %p369_p13, %p591_p4  ;;  %s621_s4 = int_to_ptr.vmem [resolvable:$true] %s145_s4 }
  0x16   : > { %s134_s6 = scalar_lea.sflag [#allocation3], %s133_s25  ;;  %s419_s7 = scalar_lea.hbm %s619_s30, 64 }
  0x17   : > { %p420_p3 = scmp.ne.s32.totalorder %s619_s30, %s419_s7  ;;  %p421_p5 = pneg %p625_p0 }
  0x18   : > { %s424_s16 = scalar_lea.hbm %s728_s0, 128  ;;  %p425_p4 = scmp.lt.u32.totalorder %s619_s30, %s728_s0 }
  0x19   : > { %p422_p6 = pnand %p421_p5, %p420_p3  ;;  %p426_p10 = scmp.lt.u32.totalorder %s424_s16, %s419_s7 }
  0x1a   : > { %p428_p12 = scmp.lt.u32.totalorder %s419_s7, %s619_s30 }
  0x1b   : > { %p423_p7 = pneg %p422_p6  ;;  %p427_p13 = por %p426_p10, %p425_p4 }
  0x1d   : > { %p429_p1 = por %p428_p12, %p427_p13 }
  0x1f   : > { %p430_p2 = pnand %p429_p1, %p423_p7 }
  0x21   : > { %433 = shalt.err (!%p430_p2)
}
  0x22   : > { %s434_s20 = scalar_lea.vmem %s621_s4, 64  ;;  %s533_s25 = smov [#allocation2]  }
  0x23   : > { %p435_p3 = scmp.ne.s32.totalorder %s621_s4, %s434_s20  ;;  %s439_s26 = sshll.u32 %s533_s25, 4  ;;  %s440_s26 = int_to_ptr.vmem [resolvable:$false] %s439_s26 }
  0x24   : > { %s441_s27 = scalar_lea.vmem %s440_s26, 128  ;;  %p442_p9 = scmp.lt.s32.totalorder %s621_s4, %s440_s26 }
  0x25   : > { %p437_p6 = pnand %p435_p3, %p421_p5  ;;  %p443_p4 = scmp.lt.s32.totalorder %s441_s27, %s434_s20 }
  0x27   : > { %p438_p11 = pneg %p437_p6  ;;  %p444_p10 = por %p443_p4, %p442_p9 }
  0x29   : > { %p445_p12 = pnand %p444_p10, %p438_p11 }
  0x2b   : > { %448 = shalt.err (!%p445_p12)
}
  0x2c   : > { %364 = dma.hbm_to_vmem [thread:$0]  (!%p625_p0), %s619_s30, 64, %s621_s4, %s134_s6  }
  0x2d   : > { %p737_p1 = scmp.lt.s32.totalorder %s531_s14, 3  ;;  %p738_p2 = scmp.ge.s32.totalorder %s531_s14, 1 }
  0x2f   : > { %p151_p5 = pnand %p738_p2, %p737_p1 }
  0x30   : > { %s661_s28 = sand.u32 (!%p151_p5), 1, %s515_s10  }
  0x31   : > { %154 = sbr.rel (%p151_p5) target bundleno = 88 (0x58), region = 24  ;;  %s352_s29 = sshll.u32 (!%p151_p5), %s661_s28, 2 }
  0x32   : > { %s157_s3 = scalar_lea.sflag (!%p151_p5), [#allocation3], %s661_s28  ;;  %s160_s7 = scalar_lea.vmem (!%p151_p5), [#allocation2], %s352_s29 }
  0x38   : > { %502 = dma.done.wait (%p597_p8), %s157_s3, 64  }
  0x39   : > { %504 = vsyncadd (%p597_p8), %s157_s3, 4294967232  ;;  %p187_p9 = scmp.lt.s32.totalorder %s523_s12, 1  ;;  %vm208_vm0 = vcmask 1042434   ;;  %vm209_vm1 = vsmask.f32 2304  ;;  %vm197_vm3 = vcmask 1043456  }
  0x3a   : > { %vm210_vm2 = vmand %vm208_vm0, %vm209_vm1  ;;  %v195_v0 = vld [vmem:[%s160_s7] sm:$0xf]  ;;  %s177_s21 = scalar_lea.vmem [#allocation5], %s661_s28  ;;  %s354_s16 = sshll.u32 %s523_s12, 4 }
  0x3b   : > { %s188_s30 = scalar_select %p187_p9, %s523_s12, 1  ;;  %v196_v2 = vmul.f32 %v195_v0, %v195_v0  ;;  %v206_v3 = vpack.c.bf16 %v195_v0, %v195_v0 }
  0x3c   : > { %s235_s15 = sshll.u32 %s177_s21, 4  ;;  %s681_s20 = scalar_lea.hbm %s729_s1, %s354_s16  ;;  %s676_s15 = int_to_ptr.vmem [resolvable:$true] %s235_s15 }
  0x3d   : > { %s353_s4 = sshll.u32 %s188_s30, 2  ;;  %v198_v5 = vsel %vm197_vm3, %v196_v2, 0.0  ;;  %s215_s25 = scalar_lea.sflag [#allocation4], %s661_s28 }
  0x3e   : > { %s193_s8 = scalar_lea.vmem %s730_s2, %s353_s4  ;;  %v199_v6 = vrot.slane %v198_v5, 4  ;;  %s449_s26 = scalar_lea.vmem %s676_s15, 16 }
  0x3f   : > { %v211_v1 = vld [vmem:[%s193_s8] sm:$0x4]  ;;  %207 = vst [vmem:[%s193_s8] sm:$0x3] %v206_v3  ;;  %p450_p8 = scmp.ne.s32.totalorder %s676_s15, %s449_s26  ;;  %p739_p11 = scmp.ne.s32.totalorder %s734_s22, 0 }
  0x40   : > { %v212_v4 = vsel %vm210_vm2, 1065369472, %v211_v1  ;;  %v200_v7 = vadd.f32 %v199_v6, %v198_v5  ;;  %s534_s12 = smov [#allocation5]  }
  0x41   : > { %213 = vst [vmem:[%s193_s8] sm:$0x4] %v212_v4  ;;  %p451_p0 = pnand %p450_p8, %p739_p11  ;;  %s453_s27 = sshll.u32 %s534_s12, 4  ;;  %s454_s27 = int_to_ptr.vmem [resolvable:$false] %s453_s27 }
  0x42   : > { %v201_v8 = vrot.slane %v200_v7, 2  ;;  %s455_s29 = scalar_lea.vmem %s454_s27, 32  ;;  %p456_p13 = scmp.lt.s32.totalorder %s676_s15, %s454_s27 }
  0x43   : > { %p452_p7 = pneg %p451_p0  ;;  %p457_p3 = scmp.lt.s32.totalorder %s455_s29, %s449_s26 }
  0x44   : > { %v202_v9 = vadd.f32 %v201_v8, %v200_v7 }
  0x45   : > { %p458_p6 = por %p457_p3, %p456_p13 }
  0x46   : > { %v203_v10 = vrot.slane %v202_v9, 1 }
  0x47   : > { %p459_p4 = pnand %p458_p6, %p452_p7 }
  0x48   : > { %v204_v11 = vadd.f32 %v203_v10, %v202_v9 }
  0x4a   : > { %205 = vst [vmem:[%s177_s21] sm:$0x1] %v204_v11 }
  0x4b   : > { %462 = shalt.err (!%p459_p4)
}
  0x4c   : > { %s463_s28 = scalar_lea.hbm %s681_s20, 16  ;;  %s467_s30 = scalar_lea.hbm %s729_s1, 32 }
  0x4d   : > { %p464_p10 = scmp.ne.s32.totalorder %s681_s20, %s463_s28  ;;  %p468_p2 = scmp.lt.u32.totalorder %s681_s20, %s729_s1 }
  0x4e   : > { %p469_p5 = scmp.lt.u32.totalorder %s467_s30, %s463_s28  ;;  %p471_p8 = scmp.lt.u32.totalorder %s463_s28, %s681_s20 }
  0x4f   : > { %p465_p12 = pnand %p464_p10, %p739_p11 }
  0x50   : > { %p470_p9 = por %p469_p5, %p468_p2 }
  0x51   : > { %p466_p1 = pneg %p465_p12 }
  0x52   : > { %p472_p0 = por %p471_p8, %p470_p9 }
  0x54   : > { %p473_p7 = pnand %p472_p0, %p466_p1 }
  0x56   : > { %476 = shalt.err (!%p473_p7)
}
  0x57   : > { %359 = dma.vmem_to_hbm [thread:$0]  (%p739_p11), %s676_s15, 16, %s681_s20, %s215_s25  }
  0x58 PF: > { %s250_s6 = sand.u32 1, %s511_s9   ;;  %p740_p13 = scmp.ne.s32.totalorder %s735_s24, 0 }
  0x59   : > { %p741_p3 = scmp.ge.s32.totalorder %s531_s14, 2  ;;  %s251_s8 = scalar_lea.sflag [#allocation4], %s250_s6 }
  0x5b   : > { %p366_p6 = pnand %p741_p3, %p740_p13 }
  0x5d   : > { %506 = dma.done.wait (!%p366_p6), %s251_s8, 16  }
  0x5e   : > { %508 = vsyncadd (!%p366_p6), %s251_s8, 4294967280  ;;  %s19_s14 = sadd.s32 1, %s531_s14   ;;  %s742_s9 = smov %s515_s10 }
  0x5f   : > { %p16_p4 = scmp.ge.s32.totalorder %s19_s14, 4   ;;  %s743_s10 = smov %s519_s11 }
  0x60   : > { %s744_s11 = smov %s606_s23  ;;  %s745_s12 = smov %s527_s13 }
  0x61   : > { %s746_s13 = smov %s748_s17  ;;  %18 = sbr.rel (!%p16_p4) target bundleno = 6 (0x6), region = 81 }
  0x68   :  { %265 = vsyncpa [#allocation3], 1 }
  0x69   :  { %267 = vsyncpa [#allocation3 + $0x1], 1 }
  0x6a   :  { %268 = vsyncpa [#allocation4], 1 }
  0x6b   :  { %270 = vsyncpa [#allocation4 + $0x1], 1 }

</bundles_post_ra>
